<compile_context>
chip_gen: v6e
topology: v6e:2x2x1
jax: 0.10.0
libtpu: 0.0.40
codegen_flags: <defaults>
</compile_context>

<pallas_src>
import functools

import jax
import jax.numpy as jnp
from jax.experimental import pallas as pl
from jax.experimental.pallas import tpu as pltpu


def mlp_kernel(x_ref, wfc_ref, bfc_ref, wproj_ref, bproj_ref, o_ref, acc_ref):
    # x_ref:     (tm, D)
    # wfc_ref:   (D, th)        bfc_ref:   (1, th)
    # wproj_ref: (th, D)        bproj_ref: (1, D)
    # o_ref:     (tm, D)        acc_ref:   (tm, D) f32 scratch
    j = pl.program_id(1)

    @pl.when(j == 0)
    def _():
        acc_ref[...] = jnp.zeros_like(acc_ref)

    # c_fc chunk: x @ W_fc[:, j*th:(j+1)*th] + b_fc chunk (f32 acc on MXU).
    h = jnp.dot(x_ref[...], wfc_ref[...], preferred_element_type=jnp.float32)
    h = h + bfc_ref[...].astype(jnp.float32)

    # SiLU(h) = h * sigmoid(h)  (elementwise -> valid per hidden chunk).
    h = h * jax.nn.sigmoid(h)

    # Partial c_proj: accumulate silu(h_chunk) @ W_proj[j*th:(j+1)*th, :].
    acc_ref[...] += jnp.dot(h.astype(wproj_ref.dtype), wproj_ref[...],
                            preferred_element_type=jnp.float32)

    @pl.when(j == pl.num_programs(1) - 1)
    def _():
        y = acc_ref[...] + bproj_ref[...].astype(jnp.float32)
        # dropout (inference) == identity
        o_ref[...] = y.astype(o_ref.dtype)


def _round_up(x, m):
    return (x + m - 1) // m * m


def _pick_hidden_tile(H, target=1024):
    """Largest divisor of H that is a multiple of 128 and <= target (else H)."""
    if H <= target:
        return H
    for cand in range(target - target % 128, 127, -128):
        if H % cand == 0:
            return cand
    return H


@functools.partial(jax.jit, static_argnames=("tm", "th", "matmul_dtype"))
def mlp_pallas(x, w_fc, b_fc, w_proj, b_proj, *, tm=256, th=None,
               matmul_dtype=None):
    """x: [B, T, D]; w_fc: [D, 4D]; b_fc: [4D]; w_proj: [4D, D]; b_proj: [D].

    matmul_dtype: optional dtype (e.g. jnp.bfloat16) for the MXU matmul inputs
    (accumulation stays f32). None keeps the input dtype.
    """
    B, T, D = x.shape
    H = w_fc.shape[1]
    M = B * T
    out_dtype = x.dtype

    mm_dtype = jnp.dtype(matmul_dtype) if matmul_dtype is not None else jnp.dtype(x.dtype)

    # Row tile: multiple of the sublane pack (16 for <4-byte dtypes, else 8);
    # pad M up to the tile instead of asserting divisibility.
    sublane = 16 if mm_dtype.itemsize < 4 else 8
    tm_eff = _round_up(min(tm, _round_up(M, sublane)), sublane)
    Mp = _round_up(M, tm_eff)

    th_eff = th if th is not None else _pick_hidden_tile(H)
    assert H % th_eff == 0, "hidden tile must divide 4*n_embd"
    n_m, n_h = Mp // tm_eff, H // th_eff

    x2 = x.reshape(M, D).astype(mm_dtype)
    if Mp != M:
        x2 = jnp.pad(x2, ((0, Mp - M), (0, 0)))
    w_fc_c = w_fc.astype(mm_dtype)
    w_proj_c = w_proj.astype(mm_dtype)
    b_fc2 = b_fc.reshape(1, H)
    b_proj2 = b_proj.reshape(1, D)

    itm = mm_dtype.itemsize
    ito = jnp.dtype(out_dtype).itemsize
    itb = jnp.dtype(b_fc2.dtype).itemsize
    # VMEM budget: double-buffered x/out/weight/bias blocks + f32 accumulator
    # scratch + the [tm, th] f32 hidden chunk.
    needed = (2 * tm_eff * D * (itm + ito)
              + 2 * (D * th_eff + th_eff * D) * itm
              + 2 * (th_eff + D) * itb
              + tm_eff * D * 4
              + tm_eff * th_eff * 4)
    vmem_limit = int(min(max(2 * needed, 16 * 2**20), 64 * 2**20))

    cost = pl.CostEstimate(
        flops=int(4 * Mp * D * H),                       # two matmuls
        transcendentals=int(Mp * H),                     # sigmoid
        bytes_accessed=int(Mp * D * (itm + ito)
                           + n_m * (D * H + H * D) * itm
                           + n_m * (H + D) * itb),
    )

    out2 = pl.pallas_call(
        mlp_kernel,
        out_shape=jax.ShapeDtypeStruct((Mp, D), out_dtype),
        grid_spec=pltpu.PrefetchScalarGridSpec(
            num_scalar_prefetch=0,
            grid=(n_m, n_h),
            in_specs=[
                pl.BlockSpec((tm_eff, D), lambda i, j: (i, 0)),    # x rows
                pl.BlockSpec((D, th_eff), lambda i, j: (0, j)),    # W_fc slice
                pl.BlockSpec((1, th_eff), lambda i, j: (0, j)),    # b_fc slice
                pl.BlockSpec((th_eff, D), lambda i, j: (j, 0)),    # W_proj slice
                pl.BlockSpec((1, D), lambda i, j: (0, 0)),         # b_proj
            ],
            out_specs=pl.BlockSpec((tm_eff, D), lambda i, j: (i, 0)),
            scratch_shapes=[pltpu.VMEM((tm_eff, D), jnp.float32)],
        ),
        compiler_params=pltpu.CompilerParams(
            dimension_semantics=("parallel", "arbitrary"),
            vmem_limit_bytes=vmem_limit),
        cost_estimate=cost,
    )(x2, w_fc_c, b_fc2, w_proj_c, b_proj2)

    return out2[:M].reshape(B, T, D)


def mlp_reference(x, w_fc, b_fc, w_proj, b_proj):
    h = jnp.einsum("btd,dh->bth", x, w_fc) + b_fc
    h = h * jax.nn.sigmoid(h)
    y = jnp.einsum("bth,hd->btd", h, w_proj) + b_proj
    return y


if __name__ == "__main__":
    # Small config consistent with the module: n_embd=32, bias=True, dropout=0.0
    B, T, D = 2, 8, 32
    H = 4 * D

    key = jax.random.PRNGKey(0)
    kx, k1, k2, k3, k4 = jax.random.split(key, 5)

    x = jax.random.normal(kx, (B, T, D), dtype=jnp.float32)
    # Deterministic "Linear" params (PyTorch stores (out, in); we keep (in, out)).
    w_fc = jax.random.normal(k1, (D, H), dtype=jnp.float32) * 0.02
    b_fc = jax.random.normal(k2, (H,), dtype=jnp.float32) * 0.02
    w_proj = jax.random.normal(k3, (H, D), dtype=jnp.float32) * 0.02
    b_proj = jax.random.normal(k4, (D,), dtype=jnp.float32) * 0.02

    ref = mlp_reference(x, w_fc, b_fc, w_proj, b_proj)

    # f32 path (matches the PyTorch module's default dtype exactly).
    out = mlp_pallas(x, w_fc, b_fc, w_proj, b_proj)
    out = jax.block_until_ready(out)
    assert out.shape == (B, T, D)
    assert jnp.allclose(out, ref, atol=1e-5, rtol=1e-5), "f32 mismatch vs reference"

    # bf16 MXU fast path (f32 accumulation) — looser tolerance by construction.
    out_bf16 = mlp_pallas(x, w_fc, b_fc, w_proj, b_proj,
                          matmul_dtype=jnp.bfloat16)
    out_bf16 = jax.block_until_ready(out_bf16)
    assert out_bf16.shape == (B, T, D)
    assert bool(jnp.all(jnp.isfinite(out_bf16)))
    assert jnp.allclose(out_bf16, ref, atol=1e-2, rtol=1e-1), "bf16 path diverged"

    print("KERNEL_OK")
</pallas_src>

<mosaic_0001>
module attributes {stable_mosaic.version = 11 : i64} {
  func.func @mlp_kernel(%arg0: i32, %arg1: i32, %arg2: memref<16x32xf32, #tpu.memory_space<vmem>>, %arg3: memref<32x128xf32, #tpu.memory_space<vmem>>, %arg4: memref<1x128xf32, #tpu.memory_space<vmem>>, %arg5: memref<128x32xf32, #tpu.memory_space<vmem>>, %arg6: memref<1x32xf32, #tpu.memory_space<vmem>>, %arg7: memref<16x32xf32, #tpu.memory_space<vmem>>, %arg8: memref<16x32xf32, #tpu.memory_space<vmem>>) attributes {dimension_semantics = [#tpu.dimension_semantics<parallel>, #tpu.dimension_semantics<arbitrary>], iteration_bounds = array<i64: 1, 1>, scalar_prefetch = 0 : i64, scratch_operands = 1 : i64, tpu.core_type = #tpu.core_type<tc>, window_params = [{transform_indices = @transform_0, window_bounds = array<i64: 16, 32>}, {transform_indices = @transform_1, window_bounds = array<i64: 32, 128>}, {transform_indices = @transform_2, window_bounds = array<i64: 1, 128>}, {transform_indices = @transform_3, window_bounds = array<i64: 128, 32>}, {pipeline_mode = #tpu.pipeline_mode<synchronous>, transform_indices = @transform_4, window_bounds = array<i64: 1, 32>}, {transform_indices = @transform_5, window_bounds = array<i64: 16, 32>}]} {
    %c0_i32 = arith.constant 0 : i32
    %0 = arith.cmpi eq, %arg1, %c0_i32 : i32
    %1 = arith.extui %0 : i1 to i32
    %c0_i32_0 = arith.constant 0 : i32
    %2 = arith.cmpi ne, %1, %c0_i32_0 : i32
    scf.if %2 {
      %cst_16 = arith.constant 0.000000e+00 : f32
      %23 = vector.broadcast %cst_16 : f32 to vector<16x32xf32>
      %c0_17 = arith.constant 0 : index
      %c0_18 = arith.constant 0 : index
      %24 = vector.load %arg8[%c0_17, %c0_18] : memref<16x32xf32, #tpu.memory_space<vmem>>, vector<16x32xf32>
      tpu.vector_store %arg8[%c0_17, %c0_18], %23 {strides = array<i32>} : memref<16x32xf32, #tpu.memory_space<vmem>>, vector<16x32xf32>,
    } else {
    }
    %c0 = arith.constant 0 : index
    %c0_1 = arith.constant 0 : index
    %3 = vector.load %arg2[%c0, %c0_1] : memref<16x32xf32, #tpu.memory_space<vmem>>, vector<16x32xf32>
    %c0_2 = arith.constant 0 : index
    %c0_3 = arith.constant 0 : index
    %4 = vector.load %arg3[%c0_2, %c0_3] : memref<32x128xf32, #tpu.memory_space<vmem>>, vector<32x128xf32>
    %cst = arith.constant dense<0.000000e+00> : vector<16x128xf32>
    %5 = tpu.matmul %3, %4, %cst {dimension_numbers = #tpu.dot_dimension_numbers<[1], [0], [0], [1], [0, 0, 1, 1], [], []>} : vector<16x32xf32>, vector<32x128xf32>, vector<16x128xf32> -> vector<16x128xf32>
    %c0_4 = arith.constant 0 : index
    %c0_5 = arith.constant 0 : index
    %6 = vector.load %arg4[%c0_4, %c0_5] : memref<1x128xf32, #tpu.memory_space<vmem>>, vector<1x128xf32>
    %7 = vector.broadcast %6 : vector<1x128xf32> to vector<16x128xf32>
    %8 = arith.addf %5, %7 : vector<16x128xf32>
    %9 = arith.negf %8 : vector<16x128xf32>
    %10 = math.exp %9 : vector<16x128xf32>
    %cst_6 = arith.constant 1.000000e+00 : f32
    %11 = vector.broadcast %cst_6 : f32 to vector<16x128xf32>
    %12 = arith.addf %11, %10 : vector<16x128xf32>
    %13 = arith.divf %11, %12 : vector<16x128xf32>
    %14 = arith.mulf %8, %13 : vector<16x128xf32>
    %c0_7 = arith.constant 0 : index
    %c0_8 = arith.constant 0 : index
    %15 = vector.load %arg8[%c0_7, %c0_8] : memref<16x32xf32, #tpu.memory_space<vmem>>, vector<16x32xf32>
    %c0_9 = arith.constant 0 : index
    %c0_10 = arith.constant 0 : index
    %16 = vector.load %arg5[%c0_9, %c0_10] : memref<128x32xf32, #tpu.memory_space<vmem>>, vector<128x32xf32>
    %cst_11 = arith.constant dense<0.000000e+00> : vector<16x32xf32>
    %17 = tpu.matmul %14, %16, %cst_11 {dimension_numbers = #tpu.dot_dimension_numbers<[1], [0], [0], [1], [0, 0, 1, 1], [], []>} : vector<16x128xf32>, vector<128x32xf32>, vector<16x32xf32> -> vector<16x32xf32>
    %18 = arith.addf %15, %17 : vector<16x32xf32>
    %c0_12 = arith.constant 0 : index
    %c0_13 = arith.constant 0 : index
    %19 = vector.load %arg8[%c0_12, %c0_13] : memref<16x32xf32, #tpu.memory_space<vmem>>, vector<16x32xf32>
    tpu.vector_store %arg8[%c0_12, %c0_13], %18 {strides = array<i32>} : memref<16x32xf32, #tpu.memory_space<vmem>>, vector<16x32xf32>,
    %c0_i32_14 = arith.constant 0 : i32
    %20 = arith.cmpi eq, %arg1, %c0_i32_14 : i32
    %21 = arith.extui %20 : i1 to i32
    %c0_i32_15 = arith.constant 0 : i32
    %22 = arith.cmpi ne, %21, %c0_i32_15 : i32
    scf.if %22 {
      %c0_16 = arith.constant 0 : index
      %c0_17 = arith.constant 0 : index
      %23 = vector.load %arg8[%c0_16, %c0_17] : memref<16x32xf32, #tpu.memory_space<vmem>>, vector<16x32xf32>
      %c0_18 = arith.constant 0 : index
      %c0_19 = arith.constant 0 : index
      %24 = vector.load %arg6[%c0_18, %c0_19] : memref<1x32xf32, #tpu.memory_space<vmem>>, vector<1x32xf32>
      %25 = vector.broadcast %24 : vector<1x32xf32> to vector<16x32xf32>
      %26 = arith.addf %23, %25 : vector<16x32xf32>
      %c0_20 = arith.constant 0 : index
      %c0_21 = arith.constant 0 : index
      %27 = vector.load %arg7[%c0_20, %c0_21] : memref<16x32xf32, #tpu.memory_space<vmem>>, vector<16x32xf32>
      tpu.vector_store %arg7[%c0_20, %c0_21], %26 {strides = array<i32>} : memref<16x32xf32, #tpu.memory_space<vmem>>, vector<16x32xf32>,
    } else {
    }
    return
  }
  func.func @transform_0(%arg0: i32, %arg1: i32) -> (i32, i32) {
    %c0_i32 = arith.constant 0 : i32
    %c0_i32_0 = arith.constant 0 : i32
    return %arg0, %c0_i32 : i32, i32
  }
  func.func @transform_1(%arg0: i32, %arg1: i32) -> (i32, i32) {
    %c0_i32 = arith.constant 0 : i32
    %c0_i32_0 = arith.constant 0 : i32
    return %c0_i32, %arg1 : i32, i32
  }
  func.func @transform_2(%arg0: i32, %arg1: i32) -> (i32, i32) {
    %c0_i32 = arith.constant 0 : i32
    %c0_i32_0 = arith.constant 0 : i32
    return %c0_i32, %arg1 : i32, i32
  }
  func.func @transform_3(%arg0: i32, %arg1: i32) -> (i32, i32) {
    %c0_i32 = arith.constant 0 : i32
    %c0_i32_0 = arith.constant 0 : i32
    return %arg1, %c0_i32 : i32, i32
  }
  func.func @transform_4(%arg0: i32, %arg1: i32) -> (i32, i32) {
    %c0_i32 = arith.constant 0 : i32
    %c0_i32_0 = arith.constant 0 : i32
    %c0_i32_1 = arith.constant 0 : i32
    return %c0_i32, %c0_i32_0 : i32, i32
  }
  func.func @transform_5(%arg0: i32, %arg1: i32) -> (i32, i32) {
    %c0_i32 = arith.constant 0 : i32
    %c0_i32_0 = arith.constant 0 : i32
    return %arg0, %c0_i32 : i32, i32
  }
}

</mosaic_0001>

<bundles_post_ra>
// kernel: mlp_pallas.1
= control target key start
LH: loop header
LB: loop body
LE: loop exit
PB: predicated region body
PF: predicated region fallthrough
CT: control target
= control target key end

     0   :  { %vm25_vm0 = vcmask 261120   ;;  %s493_s0 = inlined_call_operand.vmem [shape: f32[16,32], index: 0, kind: input, shape index: {}]   ;;  %s494_s1 = inlined_call_operand.vmem [shape: f32[32,128], index: 1, kind: input, shape index: {}]   ;;  %s495_s2 = inlined_call_operand.vmem [shape: f32[1,128], index: 2, kind: input, shape index: {}]   ;;  %s496_s3 = inlined_call_operand.vmem [shape: f32[128,32], index: 3, kind: input, shape index: {}]   ;;  %s497_s4 = inlined_call_operand.vmem [shape: f32[1,32], index: 4, kind: input, shape index: {}]   ;;  %s498_s5 = inlined_call_operand.hbm [shape: f32[16,32], index: 5, kind: output, shape index: {}]  }
   0x1   :  { %v33_v0 = vld [vmem:[%s494_s1 + $0x18] sm:$0xff]  ;;  %v32_v1 = vld [vmem:[%s494_s1 + $0x10] sm:$0xff]  ;;  %v28_v2 = vld [vmem:[%s493_s0] sm:$0xff] }
   0x2   :  { %296 = vmatprep.subr.mxu0 %v33_v0  ;;  %v31_v3 = vld [vmem:[%s494_s1 + $0x8] sm:$0xff]  ;;  %304 = vmatprep.mubr.msk.f32.mxu0 %vm25_vm0, %v28_v2 }
   0x3   :  { %297 = vmatpush3.msra.mxu0 %v33_v0 }
   0x4   :  { %10 = vsyncpa [#allocation4], 0  ;;  %298 = vmatprep.subr.mxu0 %v32_v1  ;;  %v30_v4 = vld [vmem:[%s494_s1] sm:$0xff]  ;;  %v29_v5 = vld [vmem:[%s493_s0 + $0x8] sm:$0xff]  ;;  %v376_v22 = vmov 0.0   ;;  %s377_s10 = smov [#allocation3]  }
   0x5   :  { %299 = vmatpush3.msra.mxu0 %v32_v1  ;;  %v154_v6 = vld [vmem:[%s496_s3 + $0x78] sm:$0xff]  ;;  %v153_v7 = vld [vmem:[%s496_s3 + $0x70] sm:$0xff]  ;;  %v152_v8 = vld [vmem:[%s496_s3 + $0x68] sm:$0xff]  ;;  %27 = vst.msk [vmem:[#allocation2 + $0x8] sm:$0xff] %vm25_vm0, %v376_v22  ;;  %s255_s11 = sshll.u32 %s377_s10, 4  ;;  %s256_s11 = int_to_ptr.vmem [resolvable:$true] %s255_s11 }
   0x6   :  { %300 = vmatprep.subr.mxu0 %v31_v3  ;;  %307 = vmatprep.subr.mxu1 %v154_v6  ;;  %v151_v9 = vld [vmem:[%s496_s3 + $0x60] sm:$0xff]  ;;  %v150_v10 = vld [vmem:[%s496_s3 + $0x58] sm:$0xff]  ;;  %v149_v11 = vld [vmem:[%s496_s3 + $0x50] sm:$0xff]  ;;  %26 = vst.msk [vmem:[#allocation2] sm:$0xff] %vm25_vm0, %v376_v22  ;;  %s354_s12 = scalar_lea.vmem %s256_s11, 256  ;;  %p359_p1 = scmp.lt.s32.totalorder %s256_s11, %s256_s11 }
   0x7   :  { %301 = vmatpush3.msra.mxu0 %v31_v3  ;;  %308 = vmatpush3.msra.mxu1 %v154_v6  ;;  %v148_v12 = vld [vmem:[%s496_s3 + $0x48] sm:$0xff]  ;;  %v147_v13 = vld [vmem:[%s496_s3 + $0x40] sm:$0xff]  ;;  %v146_v14 = vld [vmem:[%s496_s3 + $0x38] sm:$0xff]  ;;  %p355_p0 = scmp.ne.s32.totalorder %s256_s11, %s354_s12  ;;  %p360_p2 = scmp.lt.s32.totalorder %s354_s12, %s354_s12 }
   0x8   :  { %302 = vmatprep.subr.mxu0 %v30_v4  ;;  %309 = vmatprep.subr.mxu1 %v153_v7  ;;  %v145_v15 = vld [vmem:[%s496_s3 + $0x30] sm:$0xff]  ;;  %v144_v16 = vld [vmem:[%s496_s3 + $0x28] sm:$0xff]  ;;  %v143_v17 = vld [vmem:[%s496_s3 + $0x20] sm:$0xff] }
   0x9   :  { %303 = vmatpush3.msra.mxu0 %v30_v4  ;;  %310 = vmatpush3.msra.mxu1 %v153_v7  ;;  %v142_v18 = vld [vmem:[%s496_s3 + $0x18] sm:$0xff]  ;;  %v141_v19 = vld [vmem:[%s496_s3 + $0x10] sm:$0xff]  ;;  %v140_v20 = vld [vmem:[%s496_s3 + $0x8] sm:$0xff]  ;;  %p361_p3 = por %p360_p2, %p359_p1 }
   0xa   :  { %305 = vmatmul.mubr.msk.f32.vlgmr.msra.gmra.mxu0 %vm25_vm0, %v29_v5  ;;  %311 = vmatprep.subr.mxu1 %v152_v8  ;;  %v139_v21 = vld [vmem:[%s496_s3] sm:$0xff] }
   0xb   :  { %312 = vmatpush3.msra.mxu1 %v152_v8  ;;  %v266_v23 = vld [vmem:[%s495_s2] ss:$0 sm:$0xff]  ;;  %p362_p4 = pnand %p361_p3, %p355_p0 }
   0xc   :  { %313 = vmatprep.subr.mxu1 %v151_v9  ;;  %v138_v38 = vld [vmem:[#allocation2 + $0x8] sm:$0xff]  ;;  %v271_v44 = vld [vmem:[%s497_s4] ss:$0 sm:$0xff] }
   0xd   :  { %314 = vmatpush3.msra.mxu1 %v151_v9  ;;  %v137_v40 = vld [vmem:[#allocation2] sm:$0xff] }
   0xe   :  { %315 = vmatprep.subr.mxu1 %v150_v10 }
   0xf   :  { %316 = vmatpush3.msra.mxu1 %v150_v10 }
  0x10   :  { %317 = vmatprep.subr.mxu1 %v149_v11 }
  0x11   :  { %318 = vmatpush3.msra.mxu1 %v149_v11 }
  0x12   :  { %319 = vmatprep.subr.mxu1 %v148_v12 }
  0x13   :  { %320 = vmatpush3.msra.mxu1 %v148_v12 }
  0x14   :  { %321 = vmatprep.subr.mxu1 %v147_v13 }
  0x15   :  { %322 = vmatpush3.msra.mxu1 %v147_v13 }
  0x16   :  { %323 = vmatprep.subr.mxu1 %v146_v14 }
  0x17   :  { %324 = vmatpush3.msra.mxu1 %v146_v14 }
  0x18   :  { %325 = vmatprep.subr.mxu1 %v145_v15 }
  0x19   :  { %326 = vmatpush3.msra.mxu1 %v145_v15 }
  0x1a   :  { %327 = vmatprep.subr.mxu1 %v144_v16 }
  0x1b   :  { %328 = vmatpush3.msra.mxu1 %v144_v16 }
  0x1c   :  { %329 = vmatprep.subr.mxu1 %v143_v17 }
  0x1d   :  { %330 = vmatpush3.msra.mxu1 %v143_v17 }
  0x1e   :  { %331 = vmatprep.subr.mxu1 %v142_v18 }
  0x1f   :  { %332 = vmatpush3.msra.mxu1 %v142_v18 }
  0x20   :  { %333 = vmatprep.subr.mxu1 %v141_v19 }
  0x21   :  { %334 = vmatpush3.msra.mxu1 %v141_v19 }
  0x22   :  { %335 = vmatprep.subr.mxu1 %v140_v20 }
  0x23   :  { %336 = vmatpush3.msra.mxu1 %v140_v20 }
  0x24   :  { %337 = vmatprep.subr.mxu1 %v139_v21 }
  0x25   :  { %338 = vmatpush3.msra.mxu1 %v139_v21 }
  0xca   :  { %v306_v24 = vpop.f32.mrf.mxu0 }
  0xcb   :  { %v120_v25 = vadd.f32 %v306_v24, %v266_v23 }
  0xcc   :  { %v114_v26 = vpop.f32.mrf.mxu0 }
  0xcd   :  { %v270_v27 = vmul.f32 -1.442695, %v120_v25  ;;  %v115_v28 = vadd.f32 %v266_v23, %v114_v26 }
  0xcf   :  { %346 = vpow2.f32 %v270_v27  ;;  %v269_v29 = vmul.f32 -1.442695, %v115_v28 }
  0xd1   :  { %348 = vpow2.f32 %v269_v29 }
  0xdc   :  { %v347_v30 = vpop.eup %346 }
  0xdd   :  { %v130_v31 = vadd.f32 1.0, %v347_v30 }
  0xde   :  { %v349_v32 = vpop.eup %348 }
  0xdf   :  { %v129_v33 = vadd.f32 1.0, %v349_v32  ;;  %350 = vrcp.f32 %v130_v31 }
  0xe1   :  { %352 = vrcp.f32 %v129_v33 }
  0xec   :  { %v351_v34 = vpop.eup %350 }
  0xed   :  { %v136_v37 = vmul.f32 %v351_v34, %v120_v25 }
  0xee   :  { %v353_v35 = vpop.eup %352 }
  0xef   :  { %v135_v36 = vmul.f32 %v353_v35, %v115_v28 }
  0xf1   :  { %339 = vmatprep.mubr.f32.mxu1 %v135_v36 }
  0xf2   :  { %340 = vmatmul.mubr.f32.vlgmr.msra.gmra.mxu1 %v136_v37 }
 0x1b2   :  { %v341_v39 = vpop.f32.mrf.mxu1 }
 0x1b3   :  { %v231_v41 = vadd.f32 %v341_v39, %v138_v38 }
 0x1b4   :  { %v221_v42 = vpop.f32.mrf.mxu1 }
 0x1b5   :  { %233 = vst.msk [vmem:[#allocation2 + $0x8] sm:$0xff] %vm25_vm0, %v231_v41  ;;  %v230_v43 = vadd.f32 %v221_v42, %v137_v40 }
 0x1b7   :  { %232 = vst.msk [vmem:[#allocation2] sm:$0xff] %vm25_vm0, %v230_v43 }
 0x1bc   :  { %v238_v45 = vld [vmem:[#allocation2 + $0x8] sm:$0xff] }
 0x1bd   :  { %v247_v46 = vadd.f32 %v271_v44, %v238_v45 }
 0x1be   :  { %v237_v47 = vld [vmem:[#allocation2] sm:$0xff] }
 0x1bf   :  { %v246_v48 = vadd.f32 %v271_v44, %v237_v47  ;;  %249 = vst.msk [vmem:[#allocation3 + $0x8] sm:$0xff] %vm25_vm0, %v247_v46 }
 0x1c1   :  { %248 = vst.msk [vmem:[#allocation3] sm:$0xff] %vm25_vm0, %v246_v48 }
 0x1c2   :  { %365 = shalt.err (!%p362_p4)
}
 0x1c3   :  { %s378_s13 = smov 128   ;;  %s379_s4 = smov 8  }
 0x1c4   :  { %261 = dma.vmem_to_hbm [thread:$0]  %s256_s11, 256, %s498_s5, [#allocation4], %s378_s13, %s378_s13, %s379_s4  }
 0x1c5   :  { %374 = dma.done.wait [#allocation4], 256  }
 0x1c6   :  { %375 = vsyncadd [#allocation4], 4294967040 }
 0x1c7   :  { %265 = vsyncpa [#allocation4], 1 }

</bundles_post_ra>
